<compile_context>
chip_gen: v5e
topology: v5e:2x2
jax: 0.10.0
libtpu: 0.0.40
codegen_flags: <defaults>
</compile_context>

<pallas_src>
import jax
import jax.numpy as jnp
from jax.experimental import pallas as pl
from jax.experimental.pallas import tpu as pltpu

# ----------------------------- configuration ------------------------------
FORCE = True          # args.force; force=False branch needs autograd (see TODO).
NUM_PARTICLES = 8     # md.num_particles (small synthetic setting)
INPUT_DIM = NUM_PARTICLES * 3                       # 24
OUTPUT_DIM = NUM_PARTICLES * 3 if FORCE else 1      # 24
HIDDEN = [128, 256, 256, 256, 128]

LANE = 128
PAD_IN = LANE         # input features zero-padded 24 -> 128 (lane-dense loads)
PAD_OUT = LANE        # output features zero-padded 24 -> 128 (lane-dense stores)
MAX_TM = 256          # upper bound on the batch tile


def _round_up(x, m):
    return (x + m - 1) // m * m


# ------------------------------- kernel -----------------------------------
def _alanine_mlp_kernel(x_ref,
                        w1_ref, b1_ref,
                        w2_ref, b2_ref,
                        w3_ref, b3_ref,
                        w4_ref, b4_ref,
                        w5_ref, b5_ref,
                        w6_ref,
                        o_ref):
    """6-layer MLP; ReLU between layers, last layer bias-free.

    Activations stay f32 for the VPU ops; dot operands are cast to bf16 and
    accumulated in f32 on the MXU (weights are already bf16).
    """
    def dot_bf16(h, w_ref):
        return jnp.dot(h.astype(jnp.bfloat16), w_ref[...],
                       preferred_element_type=jnp.float32)

    h = x_ref[...]                                           # (TM, 128) f32
    h = jnp.maximum(dot_bf16(h, w1_ref) + b1_ref[...], 0.0)  # (TM, 128)
    h = jnp.maximum(dot_bf16(h, w2_ref) + b2_ref[...], 0.0)  # (TM, 256)
    h = jnp.maximum(dot_bf16(h, w3_ref) + b3_ref[...], 0.0)  # (TM, 256)
    h = jnp.maximum(dot_bf16(h, w4_ref) + b4_ref[...], 0.0)  # (TM, 256)
    h = jnp.maximum(dot_bf16(h, w5_ref) + b5_ref[...], 0.0)  # (TM, 128)
    o_ref[...] = dot_bf16(h, w6_ref)                         # (TM, 128)


# ------------------------------- wrapper -----------------------------------
@jax.jit
def alanine_forward(pos, packed_params):
    """Equivalent of Alanine.forward with force=True.

    pos: (B, num_particles, 3) float32.  packed_params: output of pack_params
    (bf16 weights, w1/w6 zero-padded to lane-dense shapes, f32 biases).
    Returns the force with the same shape as pos.
    """
    (w1, b1), (w2, b2), (w3, b3), (w4, b4), (w5, b5), w6 = packed_params

    batch_shape = pos.shape
    x = pos.reshape(-1, INPUT_DIM).astype(jnp.float32)   # pos.reshape(-1, input_dim)
    b = x.shape[0]

    # Batch tile: at most MAX_TM, at least a full sublane group (8 rows).
    tm = min(MAX_TM, _round_up(b, 8))
    b_pad = _round_up(b, tm)

    # Zero-pad batch rows to a tile multiple and features 24 -> 128.
    # The padded w1 rows are zero, so the padded lanes contribute nothing.
    x_pad = jnp.zeros((b_pad, PAD_IN), jnp.float32)
    x_pad = x_pad.at[:b, :INPUT_DIM].set(x)

    grid = (b_pad // tm,)

    tile_map = lambda i: (i, 0)       # batch-tiled x / out
    pinned = lambda i: (0, 0)         # weights/biases stay VMEM-resident (no re-DMA)

    # Blocked BlockSpecs default to VMEM; weight blocks equal the full arrays.
    in_specs = [
        pl.BlockSpec((tm, PAD_IN), tile_map),
        pl.BlockSpec(w1.shape, pinned), pl.BlockSpec(b1.shape, pinned),
        pl.BlockSpec(w2.shape, pinned), pl.BlockSpec(b2.shape, pinned),
        pl.BlockSpec(w3.shape, pinned), pl.BlockSpec(b3.shape, pinned),
        pl.BlockSpec(w4.shape, pinned), pl.BlockSpec(b4.shape, pinned),
        pl.BlockSpec(w5.shape, pinned), pl.BlockSpec(b5.shape, pinned),
        pl.BlockSpec(w6.shape, pinned),
    ]
    out_spec = pl.BlockSpec((tm, PAD_OUT), tile_map)

    out = pl.pallas_call(
        _alanine_mlp_kernel,
        out_shape=jax.ShapeDtypeStruct((b_pad, PAD_OUT), jnp.float32),
        grid=grid,
        in_specs=in_specs,
        out_specs=out_spec,
        compiler_params=pltpu.CompilerParams(
            # Independent batch tiles: lets v7x shard across its 2 TensorCores.
            dimension_semantics=("parallel",),
        ),
    )(x_pad, w1, b1, w2, b2, w3, b3, w4, b4, w5, b5, w6)

    # Drop batch/feature padding; force = out.view(*pos.shape).
    return out[:b, :OUTPUT_DIM].reshape(batch_shape)


# TODO(synk): force=False branch (output_dim=1, force = -d(sum out)/d(pos) via
# autograd) is not implemented — it requires a custom VJP / backward kernel.
# TODO(synk): for MD-style repeated tiny-batch evaluation, amortize weight DMA
# by batching many timesteps into one call or via cross-call weight prefetch (P10).


# --------------------------- parameter setup -------------------------------
def init_params(key):
    """Deterministic init mimicking nn.Linear defaults: U(-1/sqrt(fan_in), +).

    Weights stored as (in, out) so the kernel computes x @ W (== x @ W_torch.T).
    """
    dims = [INPUT_DIM] + HIDDEN + [OUTPUT_DIM]
    params = []
    for i in range(len(dims) - 1):
        fan_in, fan_out = dims[i], dims[i + 1]
        key, kw, kb = jax.random.split(key, 3)
        bound = 1.0 / float(fan_in) ** 0.5
        w = jax.random.uniform(kw, (fan_in, fan_out), jnp.float32, -bound, bound)
        if i < len(dims) - 2:  # last layer: bias=False
            bias = jax.random.uniform(kb, (1, fan_out), jnp.float32, -bound, bound)
            params.append((w, bias))
        else:
            params.append(w)
    return params


def pack_params(params):
    """One-time packing for the kernel: zero-pad w1 rows (24->128) and w6 cols
    (24->128) so the kernel's input/output are lane-dense, and cast all
    weights to bfloat16.  Biases stay float32."""
    (w1, b1), (w2, b2), (w3, b3), (w4, b4), (w5, b5), w6 = params
    w1p = jnp.zeros((PAD_IN, HIDDEN[0]), jnp.float32).at[:INPUT_DIM, :].set(w1)
    w6p = jnp.zeros((HIDDEN[-1], PAD_OUT), jnp.float32).at[:, :OUTPUT_DIM].set(w6)
    bf = lambda w: w.astype(jnp.bfloat16)
    return ((bf(w1p), b1), (bf(w2), b2), (bf(w3), b3),
            (bf(w4), b4), (bf(w5), b5), bf(w6p))


def reference_forward(pos, params):
    """Pure-JAX reference with the same numerics (bf16 dot operands, f32 acc)."""
    x = pos.reshape(-1, INPUT_DIM)
    (w1, b1), (w2, b2), (w3, b3), (w4, b4), (w5, b5), w6 = params

    def layer(h, w, bias=None):
        y = jnp.dot(h.astype(jnp.bfloat16), w.astype(jnp.bfloat16),
                    preferred_element_type=jnp.float32)
        return y if bias is None else y + bias

    h = jnp.maximum(layer(x, w1, b1), 0.0)
    h = jnp.maximum(layer(h, w2, b2), 0.0)
    h = jnp.maximum(layer(h, w3, b3), 0.0)
    h = jnp.maximum(layer(h, w4, b4), 0.0)
    h = jnp.maximum(layer(h, w5, b5), 0.0)
    return layer(h, w6).reshape(pos.shape)


# --------------------------------- main ------------------------------------
if __name__ == "__main__":
    key = jax.random.PRNGKey(0)
    key, k_pos = jax.random.split(key)

    params = init_params(key)            # f32 "PyTorch-equivalent" params
    packed = pack_params(params)         # bf16 / padded kernel params (one-time)
    log_z = jnp.float32(0.0)             # nn.Parameter(torch.tensor(0.0)); unused in forward

    # Primary small-shape run (batch=2, 8 particles, 3 coords).
    B = 2
    pos = jax.random.normal(k_pos, (B, NUM_PARTICLES, 3), dtype=jnp.float32)
    force = jax.block_until_ready(alanine_forward(pos, packed))

    ref = reference_forward(pos, params)
    assert force.shape == pos.shape
    assert jnp.allclose(force, ref, atol=2e-2, rtol=2e-2), \
        float(jnp.max(jnp.abs(force - ref)))

    # Secondary check: a batch that exercises multi-tile grid + row padding.
    key, k_pos2 = jax.random.split(key)
    pos2 = jax.random.normal(k_pos2, (300, NUM_PARTICLES, 3), dtype=jnp.float32)
    force2 = jax.block_until_ready(alanine_forward(pos2, packed))
    ref2 = reference_forward(pos2, params)
    assert jnp.allclose(force2, ref2, atol=2e-2, rtol=2e-2), \
        float(jnp.max(jnp.abs(force2 - ref2)))

    print("KERNEL_OK")
</pallas_src>

<mosaic_0001>
module attributes {stable_mosaic.version = 11 : i64} {
  func.func @_alanine_mlp_kernel(%arg0: i32, %arg1: memref<8x128xf32, #tpu.memory_space<vmem>>, %arg2: memref<128x128xbf16, #tpu.memory_space<vmem>>, %arg3: memref<1x128xf32, #tpu.memory_space<vmem>>, %arg4: memref<128x256xbf16, #tpu.memory_space<vmem>>, %arg5: memref<1x256xf32, #tpu.memory_space<vmem>>, %arg6: memref<256x256xbf16, #tpu.memory_space<vmem>>, %arg7: memref<1x256xf32, #tpu.memory_space<vmem>>, %arg8: memref<256x256xbf16, #tpu.memory_space<vmem>>, %arg9: memref<1x256xf32, #tpu.memory_space<vmem>>, %arg10: memref<256x128xbf16, #tpu.memory_space<vmem>>, %arg11: memref<1x128xf32, #tpu.memory_space<vmem>>, %arg12: memref<128x128xbf16, #tpu.memory_space<vmem>>, %arg13: memref<8x128xf32, #tpu.memory_space<vmem>>) attributes {dimension_semantics = [#tpu.dimension_semantics<parallel>], iteration_bounds = array<i64: 1>, scalar_prefetch = 0 : i64, scratch_operands = 0 : i64, tpu.core_type = #tpu.core_type<tc>, window_params = [{transform_indices = @transform_0, window_bounds = array<i64: 8, 128>}, {pipeline_mode = #tpu.pipeline_mode<synchronous>, transform_indices = @transform_1, window_bounds = array<i64: 128, 128>}, {pipeline_mode = #tpu.pipeline_mode<synchronous>, transform_indices = @transform_2, window_bounds = array<i64: 1, 128>}, {pipeline_mode = #tpu.pipeline_mode<synchronous>, transform_indices = @transform_3, window_bounds = array<i64: 128, 256>}, {pipeline_mode = #tpu.pipeline_mode<synchronous>, transform_indices = @transform_4, window_bounds = array<i64: 1, 256>}, {pipeline_mode = #tpu.pipeline_mode<synchronous>, transform_indices = @transform_5, window_bounds = array<i64: 256, 256>}, {pipeline_mode = #tpu.pipeline_mode<synchronous>, transform_indices = @transform_6, window_bounds = array<i64: 1, 256>}, {pipeline_mode = #tpu.pipeline_mode<synchronous>, transform_indices = @transform_7, window_bounds = array<i64: 256, 256>}, {pipeline_mode = #tpu.pipeline_mode<synchronous>, transform_indices = @transform_8, window_bounds = array<i64: 1, 256>}, {pipeline_mode = #tpu.pipeline_mode<synchronous>, transform_indices = @transform_9, window_bounds = array<i64: 256, 128>}, {pipeline_mode = #tpu.pipeline_mode<synchronous>, transform_indices = @transform_10, window_bounds = array<i64: 1, 128>}, {pipeline_mode = #tpu.pipeline_mode<synchronous>, transform_indices = @transform_11, window_bounds = array<i64: 128, 128>}, {transform_indices = @transform_12, window_bounds = array<i64: 8, 128>}]} {
    %c0 = arith.constant 0 : index
    %c0_0 = arith.constant 0 : index
    %0 = vector.load %arg1[%c0, %c0_0] : memref<8x128xf32, #tpu.memory_space<vmem>>, vector<8x128xf32>
    %1 = arith.truncf %0 : vector<8x128xf32> to vector<8x128xbf16>
    %c0_1 = arith.constant 0 : index
    %c0_2 = arith.constant 0 : index
    %2 = vector.load %arg2[%c0_1, %c0_2] : memref<128x128xbf16, #tpu.memory_space<vmem>>, vector<128x128xbf16>
    %cst = arith.constant dense<0.000000e+00> : vector<8x128xf32>
    %3 = tpu.matmul %1, %2, %cst {dimension_numbers = #tpu.dot_dimension_numbers<[1], [0], [0], [1], [0, 0, 1, 1], [], []>} : vector<8x128xbf16>, vector<128x128xbf16>, vector<8x128xf32> -> vector<8x128xf32>
    %c0_3 = arith.constant 0 : index
    %c0_4 = arith.constant 0 : index
    %4 = vector.load %arg3[%c0_3, %c0_4] : memref<1x128xf32, #tpu.memory_space<vmem>>, vector<1x128xf32>
    %5 = vector.broadcast %4 : vector<1x128xf32> to vector<8x128xf32>
    %6 = arith.addf %3, %5 : vector<8x128xf32>
    %cst_5 = arith.constant 0.000000e+00 : f32
    %7 = vector.broadcast %cst_5 : f32 to vector<8x128xf32>
    %8 = arith.maximumf %6, %7 : vector<8x128xf32>
    %9 = arith.truncf %8 : vector<8x128xf32> to vector<8x128xbf16>
    %c0_6 = arith.constant 0 : index
    %c0_7 = arith.constant 0 : index
    %10 = vector.load %arg4[%c0_6, %c0_7] : memref<128x256xbf16, #tpu.memory_space<vmem>>, vector<128x256xbf16>
    %cst_8 = arith.constant dense<0.000000e+00> : vector<8x256xf32>
    %11 = tpu.matmul %9, %10, %cst_8 {dimension_numbers = #tpu.dot_dimension_numbers<[1], [0], [0], [1], [0, 0, 1, 1], [], []>} : vector<8x128xbf16>, vector<128x256xbf16>, vector<8x256xf32> -> vector<8x256xf32>
    %c0_9 = arith.constant 0 : index
    %c0_10 = arith.constant 0 : index
    %12 = vector.load %arg5[%c0_9, %c0_10] : memref<1x256xf32, #tpu.memory_space<vmem>>, vector<1x256xf32>
    %13 = vector.broadcast %12 : vector<1x256xf32> to vector<8x256xf32>
    %14 = arith.addf %11, %13 : vector<8x256xf32>
    %cst_11 = arith.constant 0.000000e+00 : f32
    %15 = vector.broadcast %cst_11 : f32 to vector<8x256xf32>
    %16 = arith.maximumf %14, %15 : vector<8x256xf32>
    %17 = arith.truncf %16 : vector<8x256xf32> to vector<8x256xbf16>
    %c0_12 = arith.constant 0 : index
    %c0_13 = arith.constant 0 : index
    %18 = vector.load %arg6[%c0_12, %c0_13] : memref<256x256xbf16, #tpu.memory_space<vmem>>, vector<256x256xbf16>
    %cst_14 = arith.constant dense<0.000000e+00> : vector<8x256xf32>
    %19 = tpu.matmul %17, %18, %cst_14 {dimension_numbers = #tpu.dot_dimension_numbers<[1], [0], [0], [1], [0, 0, 1, 1], [], []>} : vector<8x256xbf16>, vector<256x256xbf16>, vector<8x256xf32> -> vector<8x256xf32>
    %c0_15 = arith.constant 0 : index
    %c0_16 = arith.constant 0 : index
    %20 = vector.load %arg7[%c0_15, %c0_16] : memref<1x256xf32, #tpu.memory_space<vmem>>, vector<1x256xf32>
    %21 = vector.broadcast %20 : vector<1x256xf32> to vector<8x256xf32>
    %22 = arith.addf %19, %21 : vector<8x256xf32>
    %cst_17 = arith.constant 0.000000e+00 : f32
    %23 = vector.broadcast %cst_17 : f32 to vector<8x256xf32>
    %24 = arith.maximumf %22, %23 : vector<8x256xf32>
    %25 = arith.truncf %24 : vector<8x256xf32> to vector<8x256xbf16>
    %c0_18 = arith.constant 0 : index
    %c0_19 = arith.constant 0 : index
    %26 = vector.load %arg8[%c0_18, %c0_19] : memref<256x256xbf16, #tpu.memory_space<vmem>>, vector<256x256xbf16>
    %cst_20 = arith.constant dense<0.000000e+00> : vector<8x256xf32>
    %27 = tpu.matmul %25, %26, %cst_20 {dimension_numbers = #tpu.dot_dimension_numbers<[1], [0], [0], [1], [0, 0, 1, 1], [], []>} : vector<8x256xbf16>, vector<256x256xbf16>, vector<8x256xf32> -> vector<8x256xf32>
    %c0_21 = arith.constant 0 : index
    %c0_22 = arith.constant 0 : index
    %28 = vector.load %arg9[%c0_21, %c0_22] : memref<1x256xf32, #tpu.memory_space<vmem>>, vector<1x256xf32>
    %29 = vector.broadcast %28 : vector<1x256xf32> to vector<8x256xf32>
    %30 = arith.addf %27, %29 : vector<8x256xf32>
    %cst_23 = arith.constant 0.000000e+00 : f32
    %31 = vector.broadcast %cst_23 : f32 to vector<8x256xf32>
    %32 = arith.maximumf %30, %31 : vector<8x256xf32>
    %33 = arith.truncf %32 : vector<8x256xf32> to vector<8x256xbf16>
    %c0_24 = arith.constant 0 : index
    %c0_25 = arith.constant 0 : index
    %34 = vector.load %arg10[%c0_24, %c0_25] : memref<256x128xbf16, #tpu.memory_space<vmem>>, vector<256x128xbf16>
    %cst_26 = arith.constant dense<0.000000e+00> : vector<8x128xf32>
    %35 = tpu.matmul %33, %34, %cst_26 {dimension_numbers = #tpu.dot_dimension_numbers<[1], [0], [0], [1], [0, 0, 1, 1], [], []>} : vector<8x256xbf16>, vector<256x128xbf16>, vector<8x128xf32> -> vector<8x128xf32>
    %c0_27 = arith.constant 0 : index
    %c0_28 = arith.constant 0 : index
    %36 = vector.load %arg11[%c0_27, %c0_28] : memref<1x128xf32, #tpu.memory_space<vmem>>, vector<1x128xf32>
    %37 = vector.broadcast %36 : vector<1x128xf32> to vector<8x128xf32>
    %38 = arith.addf %35, %37 : vector<8x128xf32>
    %cst_29 = arith.constant 0.000000e+00 : f32
    %39 = vector.broadcast %cst_29 : f32 to vector<8x128xf32>
    %40 = arith.maximumf %38, %39 : vector<8x128xf32>
    %41 = arith.truncf %40 : vector<8x128xf32> to vector<8x128xbf16>
    %c0_30 = arith.constant 0 : index
    %c0_31 = arith.constant 0 : index
    %42 = vector.load %arg12[%c0_30, %c0_31] : memref<128x128xbf16, #tpu.memory_space<vmem>>, vector<128x128xbf16>
    %cst_32 = arith.constant dense<0.000000e+00> : vector<8x128xf32>
    %43 = tpu.matmul %41, %42, %cst_32 {dimension_numbers = #tpu.dot_dimension_numbers<[1], [0], [0], [1], [0, 0, 1, 1], [], []>} : vector<8x128xbf16>, vector<128x128xbf16>, vector<8x128xf32> -> vector<8x128xf32>
    %c0_33 = arith.constant 0 : index
    %c0_34 = arith.constant 0 : index
    %44 = vector.load %arg13[%c0_33, %c0_34] : memref<8x128xf32, #tpu.memory_space<vmem>>, vector<8x128xf32>
    tpu.vector_store %arg13[%c0_33, %c0_34], %43 {strides = array<i32>} : memref<8x128xf32, #tpu.memory_space<vmem>>, vector<8x128xf32>,
    return
  }
  func.func @transform_0(%arg0: i32) -> (i32, i32) {
    %c0_i32 = arith.constant 0 : i32
    %c0_i32_0 = arith.constant 0 : i32
    return %arg0, %c0_i32 : i32, i32
  }
  func.func @transform_1(%arg0: i32) -> (i32, i32) {
    %c0_i32 = arith.constant 0 : i32
    %c0_i32_0 = arith.constant 0 : i32
    %c0_i32_1 = arith.constant 0 : i32
    return %c0_i32, %c0_i32_0 : i32, i32
  }
  func.func @transform_2(%arg0: i32) -> (i32, i32) {
    %c0_i32 = arith.constant 0 : i32
    %c0_i32_0 = arith.constant 0 : i32
    %c0_i32_1 = arith.constant 0 : i32
    return %c0_i32, %c0_i32_0 : i32, i32
  }
  func.func @transform_3(%arg0: i32) -> (i32, i32) {
    %c0_i32 = arith.constant 0 : i32
    %c0_i32_0 = arith.constant 0 : i32
    %c0_i32_1 = arith.constant 0 : i32
    return %c0_i32, %c0_i32_0 : i32, i32
  }
  func.func @transform_4(%arg0: i32) -> (i32, i32) {
    %c0_i32 = arith.constant 0 : i32
    %c0_i32_0 = arith.constant 0 : i32
    %c0_i32_1 = arith.constant 0 : i32
    return %c0_i32, %c0_i32_0 : i32, i32
  }
  func.func @transform_5(%arg0: i32) -> (i32, i32) {
    %c0_i32 = arith.constant 0 : i32
    %c0_i32_0 = arith.constant 0 : i32
    %c0_i32_1 = arith.constant 0 : i32
    return %c0_i32, %c0_i32_0 : i32, i32
  }
  func.func @transform_6(%arg0: i32) -> (i32, i32) {
    %c0_i32 = arith.constant 0 : i32
    %c0_i32_0 = arith.constant 0 : i32
    %c0_i32_1 = arith.constant 0 : i32
    return %c0_i32, %c0_i32_0 : i32, i32
  }
  func.func @transform_7(%arg0: i32) -> (i32, i32) {
    %c0_i32 = arith.constant 0 : i32
    %c0_i32_0 = arith.constant 0 : i32
    %c0_i32_1 = arith.constant 0 : i32
    return %c0_i32, %c0_i32_0 : i32, i32
  }
  func.func @transform_8(%arg0: i32) -> (i32, i32) {
    %c0_i32 = arith.constant 0 : i32
    %c0_i32_0 = arith.constant 0 : i32
    %c0_i32_1 = arith.constant 0 : i32
    return %c0_i32, %c0_i32_0 : i32, i32
  }
  func.func @transform_9(%arg0: i32) -> (i32, i32) {
    %c0_i32 = arith.constant 0 : i32
    %c0_i32_0 = arith.constant 0 : i32
    %c0_i32_1 = arith.constant 0 : i32
    return %c0_i32, %c0_i32_0 : i32, i32
  }
  func.func @transform_10(%arg0: i32) -> (i32, i32) {
    %c0_i32 = arith.constant 0 : i32
    %c0_i32_0 = arith.constant 0 : i32
    %c0_i32_1 = arith.constant 0 : i32
    return %c0_i32, %c0_i32_0 : i32, i32
  }
  func.func @transform_11(%arg0: i32) -> (i32, i32) {
    %c0_i32 = arith.constant 0 : i32
    %c0_i32_0 = arith.constant 0 : i32
    %c0_i32_1 = arith.constant 0 : i32
    return %c0_i32, %c0_i32_0 : i32, i32
  }
  func.func @transform_12(%arg0: i32) -> (i32, i32) {
    %c0_i32 = arith.constant 0 : i32
    %c0_i32_0 = arith.constant 0 : i32
    return %arg0, %c0_i32 : i32, i32
  }
}

</mosaic_0001>

<bundles_post_ra>
// kernel: alanine_forward.1
= control target key start
LH: loop header
LB: loop body
LE: loop exit
PB: predicated region body
PF: predicated region fallthrough
CT: control target
= control target key end

     0   :  { %17 = vsyncpa [#allocation3], 0  ;;  %s1944_s0 = inlined_call_operand.vmem [shape: f32[8,128], index: 0, kind: input, shape index: {}]   ;;  %s1945_s1 = inlined_call_operand.hbm [shape: bf16[128,128], index: 1, kind: input, shape index: {}]   ;;  %s1946_s2 = inlined_call_operand.vmem [shape: f32[1,128], index: 2, kind: input, shape index: {}]   ;;  %s1947_s3 = inlined_call_operand.hbm [shape: bf16[128,256], index: 3, kind: input, shape index: {}]   ;;  %s1948_s4 = inlined_call_operand.vmem [shape: f32[1,256], index: 4, kind: input, shape index: {}]   ;;  %s1949_s5 = inlined_call_operand.hbm [shape: bf16[256,256], index: 5, kind: input, shape index: {}]   ;;  %s1950_s6 = inlined_call_operand.vmem [shape: f32[1,256], index: 6, kind: input, shape index: {}]   ;;  %s1951_s7 = inlined_call_operand.hbm [shape: bf16[256,256], index: 7, kind: input, shape index: {}]   ;;  %s1952_s8 = inlined_call_operand.vmem [shape: f32[1,256], index: 8, kind: input, shape index: {}]   ;;  %s1953_s9 = inlined_call_operand.hbm [shape: bf16[256,128], index: 9, kind: input, shape index: {}]   ;;  %s1954_s10 = inlined_call_operand.vmem [shape: f32[1,128], index: 10, kind: input, shape index: {}]   ;;  %s1955_s11 = inlined_call_operand.hbm [shape: bf16[128,128], index: 11, kind: input, shape index: {}]   ;;  %s1956_s12 = inlined_call_operand.vmem [shape: f32[8,128], index: 12, kind: output, shape index: {}]  }
   0x1   :  { %18 = vsyncpa [#allocation5], 0 }
   0x2   :  { %19 = vsyncpa [#allocation8], 0  ;;  %s42_s23 = sshll.u32 %s1947_s3, 4  ;;  %s43_s23 = int_to_ptr.hbm [resolvable:$true] %s42_s23 }
   0x3   :  { %20 = vsyncpa [#allocation11], 0  ;;  %s1830_s24 = smov [#allocation4]   ;;  %s72_s28 = sshll.u32 %s1951_s7, 4  ;;  %s73_s28 = int_to_ptr.hbm [resolvable:$true] %s72_s28 }
   0x4   :  { %s44_s25 = sshll.u32 %s1830_s24, 4  ;;  %s1831_s29 = smov 128   ;;  %s45_s25 = int_to_ptr.vmem [resolvable:$true] %s44_s25 }
   0x5   :  { %s1832_s30 = smov 8   ;;  %s1833_s13 = smov [#allocation7]  }
   0x6   :  { %50 = dma.hbm_to_vmem [thread:$0]  %s43_s23, 2048, %s45_s25, [#allocation5], %s1831_s29, %s1831_s29, %s1832_s30  }
   0x7   :  { %s74_s14 = sshll.u32 %s1833_s13, 4  ;;  %s27_s17 = sshll.u32 %s1945_s1, 4  ;;  %s75_s14 = int_to_ptr.vmem [resolvable:$true] %s74_s14  ;;  %s28_s17 = int_to_ptr.hbm [resolvable:$true] %s27_s17 }
   0x8   :  { %80 = dma.hbm_to_vmem [thread:$0]  %s73_s28, 4096, %s75_s14, [#allocation8], %s1831_s29, %s1831_s29, %s1832_s30  }
   0x9   :  { %s1834_s3 = smov [#allocation2]   ;;  %s57_s7 = sshll.u32 %s1949_s5, 4  ;;  %s58_s7 = int_to_ptr.hbm [resolvable:$true] %s57_s7 }
   0xa   :  { %s29_s18 = sshll.u32 %s1834_s3, 4  ;;  %s1835_s21 = smov 64   ;;  %s30_s18 = int_to_ptr.vmem [resolvable:$true] %s29_s18 }
   0xb   :  { %s1836_s22 = smov 4   ;;  %s1837_s23 = smov [#allocation6]  }
   0xc   :  { %35 = dma.hbm_to_vmem [thread:$0]  %s28_s17, 1024, %s30_s18, [#allocation3], %s1835_s21, %s1835_s21, %s1836_s22  }
   0xd   :  { %s59_s24 = sshll.u32 %s1837_s23, 4  ;;  %s87_s1 = sshll.u32 %s1953_s9, 4  ;;  %s60_s24 = int_to_ptr.vmem [resolvable:$true] %s59_s24  ;;  %s88_s1 = int_to_ptr.hbm [resolvable:$true] %s87_s1 }
   0xe   :  { %65 = dma.hbm_to_vmem [thread:$0]  %s58_s7, 4096, %s60_s24, [#allocation5], %s1831_s29, %s1831_s29, %s1832_s30  }
   0xf   :  { %s102_s13 = sshll.u32 %s1955_s11, 4  ;;  %s1838_s14 = smov [#allocation9]   ;;  %s103_s13 = int_to_ptr.hbm [resolvable:$true] %s102_s13 }
  0x10   :  { %s89_s15 = sshll.u32 %s1838_s14, 4  ;;  %s1839_s5 = smov [#allocation10]   ;;  %s90_s15 = int_to_ptr.vmem [resolvable:$true] %s89_s15 }
  0x11   :  { %95 = dma.hbm_to_vmem [thread:$0]  %s88_s1, 2048, %s90_s15, [#allocation8], %s1835_s21, %s1835_s21, %s1836_s22  }
  0x12   :  { %s104_s16 = sshll.u32 %s1839_s5, 4  ;;  %s105_s16 = int_to_ptr.vmem [resolvable:$true] %s104_s16 }
  0x13   :  { %110 = dma.hbm_to_vmem [thread:$0]  %s103_s13, 1024, %s105_s16, [#allocation11], %s1835_s21, %s1835_s21, %s1836_s22  }
  0x14   :  { %1822 = dma.done.wait [#allocation3], 1024  }
  0x15   :  { %1823 = vsyncadd [#allocation3], 4294966272 }
  0x16   :  { %1824 = dma.done.wait [#allocation5], 6144  }
  0x17   :  { %1825 = vsyncadd [#allocation5], 4294961152 }
  0x18   :  { %1826 = dma.done.wait [#allocation8], 6144  }
  0x19   :  { %1827 = vsyncadd [#allocation8], 4294961152 }
  0x1a   :  { %1828 = dma.done.wait [#allocation11], 1024  }
  0x1b   :  { %1829 = vsyncadd [#allocation11], 4294966272  ;;  %v1561_v0 = vld [vmem:[#allocation2 + $0x38] sm:$0xff]  ;;  %v1560_v1 = vld [vmem:[#allocation2 + $0x30] sm:$0xff] }
  0x1c   :  { %205 = vmatpush.bf16.msra.mxu0 %v1561_v0  ;;  %v1196_v2 = vld [vmem:[#allocation4 + $0x70] sm:$0xf]  ;;  %v1577_v3 = vld [vmem:[#allocation4 + $0x74] sm:$0xf0]  ;;  %v1576_v4 = vld [vmem:[#allocation4 + $0x74] sm:$0xf] }
  0x1d   :  { %v1197_v5 = vor.u32 %v1577_v3, %v1196_v2  ;;  %v1198_v6 = vld [vmem:[#allocation4 + $0x78] sm:$0xf0]  ;;  %v1188_v7 = vld [vmem:[#allocation4 + $0x60] sm:$0xf]  ;;  %v1575_v8 = vld [vmem:[#allocation4 + $0x64] sm:$0xf0] }
  0x1e   :  { %v1201_v9 = vor.u32 %v1576_v4, %v1198_v6  ;;  %v1574_v10 = vld [vmem:[#allocation4 + $0x64] sm:$0xf]  ;;  %v1190_v11 = vld [vmem:[#allocation4 + $0x68] sm:$0xf0]  ;;  %v1189_v13 = vor.u32 %v1575_v8, %v1188_v7  ;;  %v1180_v15 = vld [vmem:[#allocation4 + $0x50] sm:$0xf] }
  0x1f   :  { %v1559_v12 = vld [vmem:[#allocation2 + $0x28] sm:$0xff]  ;;  %322 = vmatpush.bf16.msra.mxu1 %v1197_v5  ;;  %v1193_v14 = vor.u32 %v1574_v10, %v1190_v11  ;;  %v1573_v16 = vld [vmem:[#allocation4 + $0x54] sm:$0xf0]  ;;  %v1572_v17 = vld [vmem:[#allocation4 + $0x54] sm:$0xf] }
  0x20   :  { %206 = vmatpush.bf16.msra.mxu0 %v1560_v1  ;;  %335 = vmatpush.bf16.msra.mxu2 %v1201_v9  ;;  %v1182_v18 = vld [vmem:[#allocation4 + $0x58] sm:$0xf0]  ;;  %v1558_v19 = vld [vmem:[#allocation2 + $0x20] sm:$0xff]  ;;  %v1181_v20 = vor.u32 %v1573_v16, %v1180_v15  ;;  %v1571_v23 = vld [vmem:[#allocation4 + $0x44] sm:$0xf0] }
  0x21   :  { %v1172_v21 = vld [vmem:[#allocation4 + $0x40] sm:$0xf]  ;;  %v1185_v22 = vor.u32 %v1572_v17, %v1182_v18  ;;  %v1570_v24 = vld [vmem:[#allocation4 + $0x44] sm:$0xf]  ;;  %v1174_v25 = vld [vmem:[#allocation4 + $0x48] sm:$0xf0] }
  0x22   :  { %v1557_v26 = vld [vmem:[#allocation2 + $0x18] sm:$0xff]  ;;  %v1173_v27 = vor.u32 %v1571_v23, %v1172_v21  ;;  %v1177_v28 = vor.u32 %v1570_v24, %v1174_v25  ;;  %v1164_v29 = vld [vmem:[#allocation4 + $0x30] sm:$0xf]  ;;  %v1568_v31 = vld [vmem:[#allocation4 + $0x34] sm:$0xf] }
  0x23   :  { %323 = vmatpush.bf16.msra.mxu1 %v1189_v13  ;;  %v1569_v30 = vld [vmem:[#allocation4 + $0x34] sm:$0xf0]  ;;  %v1166_v32 = vld [vmem:[#allocation4 + $0x38] sm:$0xf0]  ;;  %v1556_v33 = vld [vmem:[#allocation2 + $0x10] sm:$0xff] }
  0x24   :  { %207 = vmatpush.bf16.msra.mxu0 %v1559_v12  ;;  %336 = vmatpush.bf16.msra.mxu2 %v1193_v14  ;;  %v1165_v34 = vor.u32 %v1569_v30, %v1164_v29  ;;  %v1169_v35 = vor.u32 %v1568_v31, %v1166_v32  ;;  %v1156_v36 = vld [vmem:[#allocation4 + $0x20] sm:$0xf]  ;;  %v1567_v37 = vld [vmem:[#allocation4 + $0x24] sm:$0xf0]  ;;  %v1566_v38 = vld [vmem:[#allocation4 + $0x24] sm:$0xf] }
  0x25   :  { %v1158_v39 = vld [vmem:[#allocation4 + $0x28] sm:$0xf0]  ;;  %v1157_v41 = vor.u32 %v1567_v37, %v1156_v36  ;;  %v1554_v43 = vld [vmem:[#allocation2] sm:$0xff]  ;;  %v1148_v46 = vld [vmem:[#allocation4 + $0x10] sm:$0xf] }
  0x26   :  { %v1555_v40 = vld [vmem:[#allocation2 + $0x8] sm:$0xff]  ;;  %v1161_v42 = vor.u32 %v1566_v38, %v1158_v39  ;;  %v135_v44 = vld [vmem:[%s1944_s0] sm:$0xff]  ;;  %v1565_v47 = vld [vmem:[#allocation4 + $0x14] sm:$0xf0] }
  0x27   :  { %324 = vmatpush.bf16.msra.mxu1 %v1181_v20  ;;  %v136_v45 = vpack.c.bf16 %v135_v44, %v135_v44  ;;  %v1564_v48 = vld [vmem:[#allocation4 + $0x14] sm:$0xf]  ;;  %v1149_v49 = vor.u32 %v1565_v47, %v1148_v46  ;;  %v1150_v50 = vld [vmem:[#allocation4 + $0x18] sm:$0xf0]  ;;  %v1140_v52 = vld [vmem:[#allocation4] sm:$0xf] }
  0x28   :  { %208 = vmatpush.bf16.msra.mxu0 %v1558_v19  ;;  %337 = vmatpush.bf16.msra.mxu2 %v1185_v22  ;;  %v1153_v51 = vor.u32 %v1564_v48, %v1150_v50  ;;  %v1563_v53 = vld [vmem:[#allocation4 + $0x4] sm:$0xf0]  ;;  %v1562_v54 = vld [vmem:[#allocation4 + $0x4] sm:$0xf]  ;;  %v1142_v56 = vld [vmem:[#allocation4 + $0x8] sm:$0xf0] }
  0x29   :  { %v1141_v55 = vor.u32 %v1563_v53, %v1140_v52  ;;  %v1145_v57 = vor.u32 %v1562_v54, %v1142_v56  ;;  %v1260_v58 = vld [vmem:[#allocation6 + $0x70] sm:$0xf]  ;;  %v1593_v59 = vld [vmem:[#allocation6 + $0x74] sm:$0xf0]  ;;  %v1592_v60 = vld [vmem:[#allocation6 + $0x74] sm:$0xf] }
  0x2a   :  { %v1261_v61 = vor.u32 %v1593_v59, %v1260_v58  ;;  %v1262_v62 = vld [vmem:[#allocation6 + $0x78] sm:$0xf0]  ;;  %v1252_v63 = vld [vmem:[#allocation6 + $0x60] sm:$0xf]  ;;  %v1591_v0 = vld [vmem:[#allocation6 + $0x64] sm:$0xf0] }
  0x2b   :  { %325 = vmatpush.bf16.msra.mxu1 %v1173_v27  ;;  %v1265_v1 = vor.u32 %v1592_v60, %v1262_v62  ;;  %v1590_v2 = vld [vmem:[#allocation6 + $0x64] sm:$0xf]  ;;  %v1254_v3 = vld [vmem:[#allocation6 + $0x68] sm:$0xf0]  ;;  %v1324_v4 = vld [vmem:[#allocation6 + $0xf0] sm:$0xf]  ;;  %v1253_v5 = vor.u32 %v1591_v0, %v1252_v63 }
  0x2c   :  { %209 = vmatpush.bf16.msra.mxu0 %v1557_v26  ;;  %338 = vmatpush.bf16.msra.mxu2 %v1177_v28  ;;  %v1609_v6 = vld [vmem:[#allocation6 + $0xf4] sm:$0xf0]  ;;  %v1608_v7 = vld [vmem:[#allocation6 + $0xf4] sm:$0xf]  ;;  %v1326_v8 = vld [vmem:[#allocation6 + $0xf8] sm:$0xf0]  ;;  %v1257_v9 = vor.u32 %v1590_v2, %v1254_v3 }
  0x2d   :  { %550 = vmatpush.bf16.msra.mxu3 %v1261_v61  ;;  %v1325_v10 = vor.u32 %v1609_v6, %v1324_v4  ;;  %v1329_v11 = vor.u32 %v1608_v7, %v1326_v8  ;;  %v1244_v12 = vld [vmem:[#allocation6 + $0x50] sm:$0xf]  ;;  %v1589_v13 = vld [vmem:[#allocation6 + $0x54] sm:$0xf0]  ;;  %v1588_v14 = vld [vmem:[#allocation6 + $0x54] sm:$0xf] }
  0x2e   :  { %v1246_v15 = vld [vmem:[#allocation6 + $0x58] sm:$0xf0]  ;;  %v1316_v16 = vld [vmem:[#allocation6 + $0xe0] sm:$0xf]  ;;  %v1607_v17 = vld [vmem:[#allocation6 + $0xe4] sm:$0xf0]  ;;  %v1245_v21 = vor.u32 %v1589_v13, %v1244_v12 }
  0x2f   :  { %326 = vmatpush.bf16.msra.mxu1 %v1165_v34  ;;  %v1317_v18 = vor.u32 %v1607_v17, %v1316_v16  ;;  %v1606_v19 = vld [vmem:[#allocation6 + $0xe4] sm:$0xf]  ;;  %v1318_v20 = vld [vmem:[#allocation6 + $0xe8] sm:$0xf0]  ;;  %v1236_v23 = vld [vmem:[#allocation6 + $0x40] sm:$0xf]  ;;  %v1249_v25 = vor.u32 %v1588_v14, %v1246_v15 }
  0x30   :  { %210 = vmatpush.bf16.msra.mxu0 %v1556_v33  ;;  %339 = vmatpush.bf16.msra.mxu2 %v1169_v35  ;;  %v1321_v22 = vor.u32 %v1606_v19, %v1318_v20  ;;  %v1587_v24 = vld [vmem:[#allocation6 + $0x44] sm:$0xf0]  ;;  %v1308_v26 = vld [vmem:[#allocation6 + $0xd0] sm:$0xf]  ;;  %v1605_v27 = vld [vmem:[#allocation6 + $0xd4] sm:$0xf0] }
  0x31   :  { %551 = vmatpush.bf16.msra.mxu3 %v1253_v5  ;;  %v1604_v28 = vld [vmem:[#allocation6 + $0xd4] sm:$0xf]  ;;  %v1586_v29 = vld [vmem:[#allocation6 + $0x44] sm:$0xf]  ;;  %v1238_v30 = vld [vmem:[#allocation6 + $0x48] sm:$0xf0]  ;;  %v1309_v32 = vor.u32 %v1605_v27, %v1308_v26  ;;  %v1237_v35 = vor.u32 %v1587_v24, %v1236_v23 }
  0x32   :  { %v1310_v31 = vld [vmem:[#allocation6 + $0xd8] sm:$0xf0]  ;;  %v1300_v34 = vld [vmem:[#allocation6 + $0xc0] sm:$0xf]  ;;  %v1603_v36 = vld [vmem:[#allocation6 + $0xc4] sm:$0xf0]  ;;  %v1241_v39 = vor.u32 %v1586_v29, %v1238_v30 }
  0x33   :  { %327 = vmatpush.bf16.msra.mxu1 %v1157_v41  ;;  %v1313_v33 = vor.u32 %v1604_v28, %v1310_v31  ;;  %v1602_v37 = vld [vmem:[#allocation6 + $0xc4] sm:$0xf]  ;;  %v1302_v38 = vld [vmem:[#allocation6 + $0xc8] sm:$0xf0]  ;;  %v1585_v41 = vld [vmem:[#allocation6 + $0x34] sm:$0xf0]  ;;  %v1301_v44 = vor.u32 %v1603_v36, %v1300_v34 }
  0x34   :  { %211 = vmatpush.bf16.msra.mxu0 %v1555_v40  ;;  %340 = vmatpush.bf16.msra.mxu2 %v1161_v42  ;;  %v1228_v40 = vld [vmem:[#allocation6 + $0x30] sm:$0xf]  ;;  %v1584_v42 = vld [vmem:[#allocation6 + $0x34] sm:$0xf]  ;;  %v1601_v48 = vld [vmem:[#allocation6 + $0xb4] sm:$0xf0] }
  0x35   :  { %552 = vmatpush.bf16.msra.mxu3 %v1245_v21  ;;  %v1292_v46 = vld [vmem:[#allocation6 + $0xb0] sm:$0xf]  ;;  %v1229_v47 = vor.u32 %v1585_v41, %v1228_v40  ;;  %v1294_v50 = vld [vmem:[#allocation6 + $0xb8] sm:$0xf0]  ;;  %v1220_v52 = vld [vmem:[#allocation6 + $0x20] sm:$0xf] }
  0x36   :  { %v1583_v53 = vld [vmem:[#allocation6 + $0x24] sm:$0xf0]  ;;  %v1582_v54 = vld [vmem:[#allocation6 + $0x24] sm:$0xf]  ;;  %v1293_v56 = vor.u32 %v1601_v48, %v1292_v46  ;;  %v1676_v60 = vld [vmem:[%s1946_s2] ss:$0 sm:$0xff] }
  0x37   :  { %328 = vmatpush.bf16.msra.mxu1 %v1149_v49  ;;  %v1600_v49 = vld [vmem:[#allocation6 + $0xb4] sm:$0xf]  ;;  %v1221_v58 = vor.u32 %v1583_v53, %v1220_v52  ;;  %v1212_v2 = vld [vmem:[#allocation6 + $0x10] sm:$0xf]  ;;  %v1581_v3 = vld [vmem:[#allocation6 + $0x14] sm:$0xf0] }
  0x38   :  { %212 = vmatpush.bf16.msra.mxu0 %v1554_v43  ;;  %341 = vmatpush.bf16.msra.mxu2 %v1153_v51  ;;  %v1230_v43 = vld [vmem:[#allocation6 + $0x38] sm:$0xf0]  ;;  %v1580_v4 = vld [vmem:[#allocation6 + $0x14] sm:$0xf]  ;;  %v1213_v5 = vor.u32 %v1581_v3, %v1212_v2  ;;  %v1284_v8 = vld [vmem:[#allocation6 + $0xa0] sm:$0xf] }
  0x39   :  { %553 = vmatpush.bf16.msra.mxu3 %v1237_v35  ;;  %v1233_v51 = vor.u32 %v1584_v42, %v1230_v43  ;;  %v1214_v6 = vld [vmem:[#allocation6 + $0x18] sm:$0xf0]  ;;  %v1286_v12 = vld [vmem:[#allocation6 + $0xa8] sm:$0xf0]  ;;  %v1204_v14 = vld [vmem:[#allocation6] sm:$0xf] }
  0x3a   :  { %v1217_v7 = vor.u32 %v1580_v4, %v1214_v6  ;;  %v1579_v15 = vld [vmem:[#allocation6 + $0x4] sm:$0xf0]  ;;  %v1578_v16 = vld [vmem:[#allocation6 + $0x4] sm:$0xf]  ;;  %v1276_v20 = vld [vmem:[#allocation6 + $0x90] sm:$0xf] }
  0x3b   :  { %213 = vmatmul.bf16.vlgmr.msra.gmra.mxu0 %v136_v45  ;;  %329 = vmatpush.bf16.msra.mxu1 %v1141_v55  ;;  %v1305_v45 = vor.u32 %v1602_v37, %v1302_v38  ;;  %v1222_v55 = vld [vmem:[#allocation6 + $0x28] sm:$0xf0]  ;;  %v1205_v17 = vor.u32 %v1579_v15, %v1204_v14  ;;  %v1597_v21 = vld [vmem:[#allocation6 + $0x94] sm:$0xf0]  ;;  %v1596_v23 = vld [vmem:[#allocation6 + $0x94] sm:$0xf] }
  0x3c   :  { %342 = vmatpush.bf16.msra.mxu2 %v1145_v57  ;;  %563 = vmatpush.bf16.msrb.mxu0 %v1325_v10  ;;  %v1297_v57 = vor.u32 %v1600_v49, %v1294_v50  ;;  %v1225_v59 = vor.u32 %v1582_v54, %v1222_v55  ;;  %v1598_v10 = vld [vmem:[#allocation6 + $0xa4] sm:$0xf]  ;;  %v1278_v24 = vld [vmem:[#allocation6 + $0x98] sm:$0xf0]  ;;  %v1268_v26 = vld [vmem:[#allocation6 + $0x80] sm:$0xf] }
  0x3d   :  { %554 = vmatpush.bf16.msra.mxu3 %v1229_v47  ;;  %v1289_v13 = vor.u32 %v1598_v10, %v1286_v12  ;;  %v1595_v27 = vld [vmem:[#allocation6 + $0x84] sm:$0xf0]  ;;  %v1594_v28 = vld [vmem:[#allocation6 + $0x84] sm:$0xf]  ;;  %v1270_v30 = vld [vmem:[#allocation6 + $0x88] sm:$0xf0] }
  0x3e   :  { %v1269_v29 = vor.u32 %v1595_v27, %v1268_v26  ;;  %v1273_v31 = vor.u32 %v1594_v28, %v1270_v30  ;;  %v1624_v34 = vld [vmem:[#allocation7 + $0x74] sm:$0xf]  ;;  %v1390_v36 = vld [vmem:[#allocation7 + $0x78] sm:$0xf0]  ;;  %v1380_v37 = vld [vmem:[#allocation7 + $0x60] sm:$0xf] }
  0x3f   :  { %576 = vmatpush.bf16.msrb.mxu1 %v1265_v1  ;;  %v1623_v38 = vld [vmem:[#allocation7 + $0x64] sm:$0xf0]  ;;  %v1452_v40 = vld [vmem:[#allocation7 + $0xf0] sm:$0xf]  ;;  %v1641_v41 = vld [vmem:[#allocation7 + $0xf4] sm:$0xf0] }
  0x40   :  { %589 = vmatpush.bf16.msrb.mxu2 %v1329_v11  ;;  %564 = vmatpush.bf16.msrb.mxu0 %v1317_v18  ;;  %v1206_v18 = vld [vmem:[#allocation6 + $0x8] sm:$0xf0]  ;;  %v1622_v42 = vld [vmem:[#allocation7 + $0x64] sm:$0xf]  ;;  %v1381_v43 = vor.u32 %v1623_v38, %v1380_v37  ;;  %v1640_v46 = vld [vmem:[#allocation7 + $0xf4] sm:$0xf] }
  0x41   :  { %555 = vmatpush.bf16.msra.mxu3 %v1221_v58  ;;  %v1209_v19 = vor.u32 %v1578_v16, %v1206_v18  ;;  %v1454_v47 = vld [vmem:[#allocation7 + $0xf8] sm:$0xf0]  ;;  %v1372_v50 = vld [vmem:[#allocation7 + $0x50] sm:$0xf]  ;;  %v1444_v52 = vld [vmem:[#allocation7 + $0xe0] sm:$0xf] }
  0x42   :  { %v1457_v49 = vor.u32 %v1640_v46, %v1454_v47  ;;  %v1639_v53 = vld [vmem:[#allocation7 + $0xe4] sm:$0xf0]  ;;  %v1620_v54 = vld [vmem:[#allocation7 + $0x54] sm:$0xf]  ;;  %v1374_v55 = vld [vmem:[#allocation7 + $0x58] sm:$0xf0] }
  0x43   :  { %577 = vmatpush.bf16.msrb.mxu1 %v1257_v9  ;;  %v1599_v9 = vld [vmem:[#allocation6 + $0xa4] sm:$0xf0]  ;;  %v1446_v58 = vld [vmem:[#allocation7 + $0xe8] sm:$0xf0]  ;;  %v1636_v2 = vld [vmem:[#allocation7 + $0xd4] sm:$0xf] }
  0x44   :  { %590 = vmatpush.bf16.msrb.mxu2 %v1321_v22  ;;  %565 = vmatpush.bf16.msrb.mxu0 %v1309_v32  ;;  %v1285_v11 = vor.u32 %v1599_v9, %v1284_v8  ;;  %v1277_v22 = vor.u32 %v1597_v21, %v1276_v20  ;;  %v1388_v32 = vld [vmem:[#allocation7 + $0x70] sm:$0xf]  ;;  %v1618_v4 = vld [vmem:[#allocation7 + $0x44] sm:$0xf]  ;;  %v1438_v6 = vld [vmem:[#allocation7 + $0xd8] sm:$0xf0] }
  0x45   :  { %556 = vmatpush.bf16.msra.mxu3 %v1213_v5  ;;  %v1366_v5 = vld [vmem:[#allocation7 + $0x48] sm:$0xf0]  ;;  %v236_v9 = vld [vmem:[%s1948_s4] sm:$0x3]  ;;  %v1635_v27 = vld [vmem:[#allocation7 + $0xc4] sm:$0xf0] }
  0x46   :  { %v1369_v10 = vor.u32 %v1618_v4, %v1366_v5  ;;  %v239_v15 = vperm.slane %v236_v9, 1  ;;  %v1616_v28 = vld [vmem:[#allocation7 + $0x34] sm:$0xf]  ;;  %v1420_v37 = vld [vmem:[#allocation7 + $0xb0] sm:$0xf] }
  0x47   :  { %578 = vmatpush.bf16.msrb.mxu1 %v1249_v25  ;;  %v1281_v25 = vor.u32 %v1596_v23, %v1278_v24  ;;  %v1356_v23 = vld [vmem:[#allocation7 + $0x30] sm:$0xf]  ;;  %v1617_v24 = vld [vmem:[#allocation7 + $0x34] sm:$0xf0]  ;;  %v1628_v4 = vld [vmem:[#allocation7 + $0x94] sm:$0xf] }
  0x48   :  { %591 = vmatpush.bf16.msrb.mxu2 %v1313_v33  ;;  %566 = vmatpush.bf16.msrb.mxu0 %v1301_v44  ;;  %v1625_v33 = vld [vmem:[#allocation7 + $0x74] sm:$0xf0]  ;;  %v1453_v44 = vor.u32 %v1641_v41, %v1452_v40  ;;  %v1357_v26 = vor.u32 %v1617_v24, %v1356_v23  ;;  %v1614_v40 = vld [vmem:[#allocation7 + $0x24] sm:$0xf]  ;;  %v1350_v41 = vld [vmem:[#allocation7 + $0x28] sm:$0xf0] }
  0x49   :  { %557 = vmatpush.bf16.msra.mxu3 %v1205_v17  ;;  %v1389_v35 = vor.u32 %v1625_v33, %v1388_v32  ;;  %v1634_v32 = vld [vmem:[#allocation7 + $0xc4] sm:$0xf]  ;;  %v1430_v33 = vld [vmem:[#allocation7 + $0xc8] sm:$0xf0]  ;;  %v1340_v47 = vld [vmem:[#allocation7 + $0x10] sm:$0xf] }
  0x4a   :  { %v1406_v5 = vld [vmem:[#allocation7 + $0x98] sm:$0xf0] }
  0x4b   :  { %579 = vmatpush.bf16.msrb.mxu1 %v1241_v39  ;;  %v1393_v39 = vor.u32 %v1624_v34, %v1390_v36  ;;  %v1433_v34 = vor.u32 %v1634_v32, %v1430_v33  ;;  %v1615_v36 = vld [vmem:[#allocation7 + $0x24] sm:$0xf0] }
  0x4c   :  { %592 = vmatpush.bf16.msrb.mxu2 %v1305_v45  ;;  %567 = vmatpush.bf16.msrb.mxu0 %v1293_v56  ;;  %v1382_v45 = vld [vmem:[#allocation7 + $0x68] sm:$0xf0]  ;;  %v1445_v56 = vor.u32 %v1639_v53, %v1444_v52  ;;  %v1612_v52 = vld [vmem:[#allocation7 + $0x14] sm:$0xf]  ;;  %v1342_v53 = vld [vmem:[#allocation7 + $0x18] sm:$0xf0] }
  0x4d   :  { %804 = vmatpush.bf16.msrb.mxu3 %v1389_v35  ;;  %v1385_v48 = vor.u32 %v1622_v42, %v1382_v45  ;;  %v1348_v35 = vld [vmem:[#allocation7 + $0x20] sm:$0xf]  ;;  %v1422_v45 = vld [vmem:[#allocation7 + $0xb8] sm:$0xf0] }
  0x4e   :  { %v1349_v38 = vor.u32 %v1615_v36, %v1348_v35 }
  0x4f   :  { %580 = vmatpush.bf16.msrb.mxu1 %v1233_v51  ;;  %v1621_v51 = vld [vmem:[#allocation7 + $0x54] sm:$0xf0] }
  0x50   :  { %593 = vmatpush.bf16.msrb.mxu2 %v1297_v57  ;;  %568 = vmatpush.bf16.msrb.mxu0 %v1285_v11  ;;  %v1638_v57 = vld [vmem:[#allocation7 + $0xe4] sm:$0xf]  ;;  %v238_v11 = vperm.slane %v236_v9, 0 }
  0x51   :  { %805 = vmatpush.bf16.msrb.mxu3 %v1381_v43  ;;  %v1353_v43 = vor.u32 %v1614_v40, %v1350_v41  ;;  %v1626_v9 = vld [vmem:[#allocation7 + $0x84] sm:$0xf]  ;;  %v1645_v40 = vld [vmem:[#allocation9 + $0x18] sm:$0xff] }
  0x52   :  { %v1653_v41 = vld [vmem:[#allocation9 + $0x58] sm:$0xff] }
  0x53   :  { %581 = vmatpush.bf16.msrb.mxu1 %v1225_v59  ;;  %v1373_v59 = vor.u32 %v1621_v51, %v1372_v50  ;;  %v1631_v51 = vld [vmem:[#allocation7 + $0xa4] sm:$0xf0] }
  0x54   :  { %594 = vmatpush.bf16.msrb.mxu2 %v1289_v13  ;;  %569 = vmatpush.bf16.msrb.mxu0 %v1277_v22 }
  0x55   :  { %806 = vmatpush.bf16.msrb.mxu3 %v1373_v59  ;;  %v1332_v59 = vld [vmem:[#allocation7] sm:$0xf] }
  0x57   :  { %582 = vmatpush.bf16.msrb.mxu1 %v1217_v7  ;;  %v1441_v7 = vor.u32 %v1636_v2, %v1438_v6  ;;  %v1409_v6 = vor.u32 %v1628_v4, %v1406_v5 }
  0x58   :  { %595 = vmatpush.bf16.msrb.mxu2 %v1281_v25  ;;  %570 = vmatpush.bf16.msrb.mxu0 %v1269_v29  ;;  %v1428_v25 = vld [vmem:[#allocation7 + $0xc0] sm:$0xf]  ;;  %v1358_v29 = vld [vmem:[#allocation7 + $0x38] sm:$0xf0] }
  0x59   :  { %v1429_v30 = vor.u32 %v1635_v27, %v1428_v25 }
  0x5b   :  { %583 = vmatpush.bf16.msrb.mxu1 %v1209_v19 }
  0x5c   :  { %596 = vmatpush.bf16.msrb.mxu2 %v1273_v31  ;;  %817 = vmatpush.bf16.msra.mxu0 %v1453_v44  ;;  %v1361_v31 = vor.u32 %v1616_v28, %v1358_v29  ;;  %v1632_v44 = vld [vmem:[#allocation7 + $0xb4] sm:$0xf] }
  0x5d   :  { %v1425_v46 = vor.u32 %v1632_v44, %v1422_v45  ;;  %v1643_v44 = vld [vmem:[#allocation9 + $0x8] sm:$0xff] }
  0x5e   :  { %v1651_v45 = vld [vmem:[#allocation9 + $0x48] sm:$0xff] }
  0x60   :  { %818 = vmatpush.bf16.msra.mxu0 %v1445_v56  ;;  %v1630_v56 = vld [vmem:[#allocation7 + $0xa4] sm:$0xf] }
  0xb8   :  { %v214_v61 = vpop.f32.mrf.mxu0 }
  0xb9   :  { %v215_v62 = vadd.f32 %v1676_v60, %v214_v61  ;;  %v1449_v60 = vor.u32 %v1638_v57, %v1446_v58  ;;  %v1436_v61 = vld [vmem:[#allocation7 + $0xd0] sm:$0xf]  ;;  %v1414_v57 = vld [vmem:[#allocation7 + $0xa8] sm:$0xf0] }
  0xba   :  { %v1417_v58 = vor.u32 %v1630_v56, %v1414_v57 }
  0xbb   :  { %v218_v63 = vmax.f32 %v215_v62, 0.0  ;;  %v1637_v62 = vld [vmem:[#allocation7 + $0xd4] sm:$0xf0] }
  0xbc   :  { %v1437_v3 = vor.u32 %v1637_v62, %v1436_v61  ;;  %v1404_v61 = vld [vmem:[#allocation7 + $0x90] sm:$0xf] }
  0xbd   :  { %v219_v0 = vpack.c.bf16 %v218_v63, %v218_v63  ;;  %v1377_v63 = vor.u32 %v1620_v54, %v1374_v55  ;;  %v1345_v55 = vor.u32 %v1612_v52, %v1342_v53  ;;  %v1661_v53 = vld [vmem:[#allocation10 + $0x18] sm:$0xff] }
  0xbe   :  { %819 = vmatpush.bf16.msra.mxu0 %v1437_v3 }
  0xbf   :  { %330 = vmatmul.bf16.vlgmr.msra.gmra.mxu1 %v219_v0  ;;  %343 = vmatmul.bf16.vlgmr.msra.gmra.mxu2 %v219_v0  ;;  %v1364_v0 = vld [vmem:[#allocation7 + $0x40] sm:$0xf] }
  0xc0   :  { %v216_v1 = vpop.f32.mrf.mxu0  ;;  %830 = vmatpush.bf16.msra.mxu1 %v1393_v39  ;;  %843 = vmatpush.bf16.msra.mxu2 %v1457_v49  ;;  %v1633_v39 = vld [vmem:[#allocation7 + $0xb4] sm:$0xf0]  ;;  %v1412_v49 = vld [vmem:[#allocation7 + $0xa0] sm:$0xf] }
  0xc1   :  { %v1619_v1 = vld [vmem:[#allocation7 + $0x44] sm:$0xf0]  ;;  %v1421_v42 = vor.u32 %v1633_v39, %v1420_v37  ;;  %v1413_v54 = vor.u32 %v1631_v51, %v1412_v49  ;;  %v1664_v49 = vld [vmem:[#allocation10 + $0x30] sm:$0xff]  ;;  %v1662_v51 = vld [vmem:[#allocation10 + $0x20] sm:$0xff] }
  0xc2   :  { %v1365_v8 = vor.u32 %v1619_v1, %v1364_v0  ;;  %820 = vmatpush.bf16.msra.mxu0 %v1429_v30  ;;  %v1610_v0 = vld [vmem:[#allocation7 + $0x4] sm:$0xf]  ;;  %v1334_v1 = vld [vmem:[#allocation7 + $0x8] sm:$0xf0] }
  0xc3   :  { %v1337_v3 = vor.u32 %v1610_v0, %v1334_v1 }
  0xc4   :  { %831 = vmatpush.bf16.msra.mxu1 %v1385_v48  ;;  %844 = vmatpush.bf16.msra.mxu2 %v1449_v60  ;;  %v1613_v48 = vld [vmem:[#allocation7 + $0x14] sm:$0xf0]  ;;  %v1611_v60 = vld [vmem:[#allocation7 + $0x4] sm:$0xf0] }
  0xc5   :  { %807 = vmatpush.bf16.msrb.mxu3 %v1365_v8  ;;  %v1341_v50 = vor.u32 %v1613_v48, %v1340_v47  ;;  %v1333_v62 = vor.u32 %v1611_v60, %v1332_v59  ;;  %v1627_v8 = vld [vmem:[#allocation7 + $0x84] sm:$0xf0]  ;;  %v1650_v47 = vld [vmem:[#allocation9 + $0x40] sm:$0xff]  ;;  %v1665_v48 = vld [vmem:[#allocation10 + $0x38] sm:$0xff] }
  0xc6   :  { %821 = vmatpush.bf16.msra.mxu0 %v1421_v42  ;;  %v1644_v42 = vld [vmem:[#allocation9 + $0x10] sm:$0xff] }
  0xc8   :  { %832 = vmatpush.bf16.msra.mxu1 %v1377_v63  ;;  %845 = vmatpush.bf16.msra.mxu2 %v1441_v7  ;;  %v1629_v63 = vld [vmem:[#allocation7 + $0x94] sm:$0xf0]  ;;  %v1396_v7 = vld [vmem:[#allocation7 + $0x80] sm:$0xf] }
  0xc9   :  { %808 = vmatpush.bf16.msrb.mxu3 %v1357_v26  ;;  %v1405_v2 = vor.u32 %v1629_v63, %v1404_v61 }
  0xca   :  { %822 = vmatpush.bf16.msra.mxu0 %v1413_v54  ;;  %v638_v54 = vld [vmem:[%s1952_s8] sm:$0x3] }
  0xcb   :  { %v641_v57 = vperm.slane %v638_v54, 1 }
  0xcc   :  { %833 = vmatpush.bf16.msra.mxu1 %v1369_v10  ;;  %846 = vmatpush.bf16.msra.mxu2 %v1433_v34  ;;  %v1397_v10 = vor.u32 %v1627_v8, %v1396_v7  ;;  %v1660_v8 = vld [vmem:[#allocation10 + $0x10] sm:$0xff] }
  0xcd   :  { %809 = vmatpush.bf16.msrb.mxu3 %v1349_v38 }
  0xce   :  { %823 = vmatpush.bf16.msra.mxu0 %v1405_v2 }
  0xd0   :  { %834 = vmatpush.bf16.msra.mxu1 %v1361_v31  ;;  %847 = vmatpush.bf16.msra.mxu2 %v1425_v46  ;;  %v1642_v46 = vld [vmem:[#allocation9] sm:$0xff] }
  0xd1   :  { %810 = vmatpush.bf16.msrb.mxu3 %v1341_v50  ;;  %v1663_v50 = vld [vmem:[#allocation10 + $0x28] sm:$0xff] }
  0xd2   :  { %824 = vmatpush.bf16.msra.mxu0 %v1397_v10  ;;  %v1658_v10 = vld [vmem:[#allocation10] sm:$0xff] }
  0xd4   :  { %835 = vmatpush.bf16.msra.mxu1 %v1353_v43  ;;  %848 = vmatpush.bf16.msra.mxu2 %v1417_v58  ;;  %v1652_v43 = vld [vmem:[#allocation9 + $0x50] sm:$0xff] }
  0xd5   :  { %811 = vmatpush.bf16.msrb.mxu3 %v1333_v62 }
  0xd8   :  { %836 = vmatpush.bf16.msra.mxu1 %v1345_v55  ;;  %849 = vmatpush.bf16.msra.mxu2 %v1409_v6  ;;  %v640_v55 = vperm.slane %v638_v54, 0 }
  0xdc   :  { %837 = vmatpush.bf16.msra.mxu1 %v1337_v3 }
 0x13c   :  { %v331_v12 = vpop.f32.mrf.mxu1 }
 0x13d   :  { %v332_v13 = vadd.f32 %v331_v12, %v238_v11  ;;  %v1398_v11 = vld [vmem:[#allocation7 + $0x88] sm:$0xf0] }
 0x13e   :  { %v1401_v12 = vor.u32 %v1626_v9, %v1398_v11  ;;  %v1659_v9 = vld [vmem:[#allocation10 + $0x8] sm:$0xff] }
 0x13f   :  { %v348_v14 = vmax.f32 %v332_v13, 0.0  ;;  %v1649_v13 = vld [vmem:[#allocation9 + $0x38] sm:$0xff] }
 0x140   :  { %850 = vmatpush.bf16.msra.mxu2 %v1401_v12  ;;  %v1677_v12 = vld [vmem:[%s1954_s10] ss:$0 sm:$0xff] }
 0x141   :  { %v350_v16 = vpack.c.bf16 %v348_v14, %v348_v14  ;;  %v1657_v14 = vld [vmem:[#allocation9 + $0x78] sm:$0xff] }
 0x142   :  { %v344_v17 = vpop.f32.mrf.mxu2 }
 0x143   :  { %v345_v18 = vadd.f32 %v344_v17, %v239_v15  ;;  %558 = vmatmul.bf16.vlgmr.msra.gmra.mxu3 %v350_v16  ;;  %584 = vmatmul.bf16.vlgmr.msrb.gmra.mxu1 %v350_v16  ;;  %v1648_v15 = vld [vmem:[#allocation9 + $0x30] sm:$0xff]  ;;  %v1647_v17 = vld [vmem:[#allocation9 + $0x28] sm:$0xff] }
 0x144   :  { %v333_v19 = vpop.f32.mrf.mxu1  ;;  %992 = vmatpush.bf16.msra.mxu3 %v1649_v13  ;;  %v1656_v16 = vld [vmem:[#allocation9 + $0x70] sm:$0xff]  ;;  %1084 = vmatpush.bf16.msrb.mxu1 %v1665_v48 }
 0x145   :  { %v349_v20 = vmax.f32 %v345_v18, 0.0  ;;  %v1655_v18 = vld [vmem:[#allocation9 + $0x68] sm:$0xff]  ;;  %v1646_v19 = vld [vmem:[#allocation9 + $0x20] sm:$0xff] }
 0x147   :  { %v351_v21 = vpack.c.bf16 %v349_v20, %v349_v20  ;;  %v1654_v20 = vld [vmem:[#allocation9 + $0x60] sm:$0xff] }
 0x148   :  { %993 = vmatpush.bf16.msra.mxu3 %v1648_v15  ;;  %1085 = vmatpush.bf16.msrb.mxu1 %v1664_v49 }
 0x149   :  { %571 = vmatmul.bf16.vlgmr.msrb.gmra.mxu0 %v351_v21  ;;  %597 = vmatmul.bf16.vlgmr.msrb.gmra.mxu2 %v351_v21 }
 0x14a   :  { %v346_v22 = vpop.f32.mrf.mxu2  ;;  %1005 = vmatpush.bf16.msrb.mxu0 %v1657_v14 }
 0x14b   :  { %v384_v22 = vld [vmem:[%s1950_s6] sm:$0x3] }
 0x14c   :  { %994 = vmatpush.bf16.msra.mxu3 %v1647_v17  ;;  %v386_v23 = vperm.slane %v384_v22, 0  ;;  %v387_v26 = vperm.slane %v384_v22, 1  ;;  %1086 = vmatpush.bf16.msrb.mxu1 %v1663_v50 }
 0x14e   :  { %1006 = vmatpush.bf16.msrb.mxu0 %v1656_v16 }
 0x150   :  { %995 = vmatpush.bf16.msra.mxu3 %v1646_v19  ;;  %1087 = vmatpush.bf16.msrb.mxu1 %v1662_v51 }
 0x152   :  { %1007 = vmatpush.bf16.msrb.mxu0 %v1655_v18 }
 0x154   :  { %996 = vmatpush.bf16.msra.mxu3 %v1645_v40  ;;  %1088 = vmatpush.bf16.msrb.mxu1 %v1661_v53 }
 0x156   :  { %1008 = vmatpush.bf16.msrb.mxu0 %v1654_v20 }
 0x158   :  { %997 = vmatpush.bf16.msra.mxu3 %v1644_v42  ;;  %1089 = vmatpush.bf16.msrb.mxu1 %v1660_v8 }
 0x15a   :  { %1009 = vmatpush.bf16.msrb.mxu0 %v1653_v41 }
 0x15c   :  { %998 = vmatpush.bf16.msra.mxu3 %v1643_v44  ;;  %1090 = vmatpush.bf16.msrb.mxu1 %v1659_v9 }
 0x15e   :  { %1010 = vmatpush.bf16.msrb.mxu0 %v1652_v43 }
 0x160   :  { %999 = vmatpush.bf16.msra.mxu3 %v1642_v46  ;;  %1091 = vmatpush.bf16.msrb.mxu1 %v1658_v10 }
 0x162   :  { %1011 = vmatpush.bf16.msrb.mxu0 %v1651_v45 }
 0x166   :  { %1012 = vmatpush.bf16.msrb.mxu0 %v1650_v47 }
 0x1c0   :  { %v585_v21 = vpop.f32.mrf.mxu1 }
 0x1c1   :  { %v586_v30 = vadd.f32 %v585_v21, %v387_v26 }
 0x1c6   :  { %v559_v24 = vpop.f32.mrf.mxu3  ;;  %v572_v25 = vpop.f32.mrf.mxu0 }
 0x1c7   :  { %v560_v27 = vadd.f32 %v559_v24, %v386_v23 }
 0x1c8   :  { %v587_v28 = vpop.f32.mrf.mxu1 }
 0x1c9   :  { %v573_v29 = vadd.f32 %v572_v25, %v560_v27 }
 0x1cb   :  { %v602_v31 = vmax.f32 %v573_v29, 0.0 }
 0x1cc   :  { %v598_v32 = vpop.f32.mrf.mxu2 }
 0x1cd   :  { %v604_v33 = vpack.c.bf16 %v602_v31, %v602_v31  ;;  %v599_v34 = vadd.f32 %v598_v32, %v586_v30 }
 0x1ce   :  { %v561_v35 = vpop.f32.mrf.mxu3  ;;  %v574_v36 = vpop.f32.mrf.mxu0 }
 0x1cf   :  { %v603_v37 = vmax.f32 %v599_v34, 0.0  ;;  %812 = vmatmul.bf16.vlgmr.msrb.gmra.mxu3 %v604_v33  ;;  %838 = vmatmul.bf16.vlgmr.msra.gmra.mxu1 %v604_v33 }
 0x1d1   :  { %v605_v38 = vpack.c.bf16 %v603_v37, %v603_v37 }
 0x1d3   :  { %825 = vmatmul.bf16.vlgmr.msra.gmra.mxu0 %v605_v38  ;;  %851 = vmatmul.bf16.vlgmr.msra.gmra.mxu2 %v605_v38 }
 0x1d4   :  { %v600_v39 = vpop.f32.mrf.mxu2 }
 0x24c   :  { %v839_v52 = vpop.f32.mrf.mxu1 }
 0x24d   :  { %v840_v61 = vadd.f32 %v839_v52, %v641_v57 }
 0x250   :  { %v826_v56 = vpop.f32.mrf.mxu0 }
 0x252   :  { %v813_v58 = vpop.f32.mrf.mxu3 }
 0x253   :  { %v814_v59 = vadd.f32 %v813_v58, %v640_v55 }
 0x254   :  { %v841_v60 = vpop.f32.mrf.mxu1 }
 0x255   :  { %v827_v62 = vadd.f32 %v826_v56, %v814_v59 }
 0x256   :  { %v852_v63 = vpop.f32.mrf.mxu2 }
 0x257   :  { %v856_v0 = vmax.f32 %v827_v62, 0.0  ;;  %v853_v1 = vadd.f32 %v852_v63, %v840_v61 }
 0x258   :  { %v828_v2 = vpop.f32.mrf.mxu0 }
 0x259   :  { %v858_v3 = vpack.c.bf16 %v856_v0, %v856_v0  ;;  %v857_v4 = vmax.f32 %v853_v1, 0.0 }
 0x25a   :  { %v815_v5 = vpop.f32.mrf.mxu3 }
 0x25b   :  { %v859_v6 = vpack.c.bf16 %v857_v4, %v857_v4  ;;  %1000 = vmatmul.bf16.vlgmr.msra.gmra.mxu3 %v858_v3 }
 0x25d   :  { %1013 = vmatmul.bf16.vlgmr.msrb.gmra.mxu0 %v859_v6 }
 0x25e   :  { %v854_v7 = vpop.f32.mrf.mxu2 }
 0x2da   :  { %v1014_v11 = vpop.f32.mrf.mxu0 }
 0x2de   :  { %v1001_v13 = vpop.f32.mrf.mxu3 }
 0x2df   :  { %v1002_v14 = vadd.f32 %v1677_v12, %v1001_v13 }
 0x2e1   :  { %v1015_v15 = vadd.f32 %v1014_v11, %v1002_v14 }
 0x2e2   :  { %v1016_v16 = vpop.f32.mrf.mxu0 }
 0x2e3   :  { %v1018_v17 = vmax.f32 %v1015_v15, 0.0 }
 0x2e5   :  { %v1019_v18 = vpack.c.bf16 %v1018_v17, %v1018_v17 }
 0x2e6   :  { %v1003_v19 = vpop.f32.mrf.mxu3 }
 0x2e7   :  { %1092 = vmatmul.bf16.vlgmr.msrb.gmra.mxu1 %v1019_v18 }
 0x364   :  { %v1093_v20 = vpop.f32.mrf.mxu1 }
 0x365   :  { %1097 = vst [vmem:[%s1956_s12] sm:$0xff] %v1093_v20 }
 0x36c   :  { %v1095_v21 = vpop.f32.mrf.mxu1 }
 0x36d   :  { %1102 = vsyncpa [#allocation3], 1 }
 0x36e   :  { %1103 = vsyncpa [#allocation5], 1 }
 0x36f   :  { %1104 = vsyncpa [#allocation8], 1 }
 0x370   :  { %1105 = vsyncpa [#allocation11], 1 }

</bundles_post_ra>
